<compile_context>
chip_gen: v7x
topology: tpu7x:2x2x1
jax: 0.10.0
libtpu: 0.0.40
codegen_flags: <defaults>
</compile_context>

<pallas_src>
import jax
import jax.numpy as jnp
from jax.experimental import pallas as pl
from jax.experimental.pallas import tpu as pltpu


def _round_up(a: int, b: int) -> int:
    return (a + b - 1) // b * b


# ---------------------------------------------------------------------------
# Pallas kernel
# ---------------------------------------------------------------------------
def _layerscale_kernel(x_ref, g_ref, o_ref):
    # f32 internal math (gamma arrives as f32); cast back only at the store.
    o_ref[...] = (x_ref[...].astype(jnp.float32) * g_ref[...]).astype(o_ref.dtype)


def layer_scale(x, gamma, *, tn_max: int = 2048,
                target_block_bytes: int = 8 * 1024 * 1024):
    """LayerScale forward: x * gamma, gamma broadcast over the last axis.

    x: (..., D), gamma: (D,).  Returns an array of the same shape/dtype as x.
    """
    orig_shape = x.shape
    D = orig_shape[-1]
    assert gamma.shape == (D,), (gamma.shape, D)

    x2d = x.reshape(-1, D)          # free reshape (contiguous last dim)
    M = x2d.shape[0]

    itemsize = jnp.dtype(x.dtype).itemsize
    sublane = max(8, 32 // itemsize)        # 8 f32, 16 bf16, 32 int8/fp8

    # Lane tile: multiple of 128 (lane-dense, unmasked vst), capped at tn_max.
    tn = min(tn_max, _round_up(D, 128))
    # Row tile: ~target_block_bytes per block, rounded to the dtype's sublane
    # packing, never larger than the (sublane-rounded) row count.
    tm = max(sublane, (target_block_bytes // (tn * itemsize)) // sublane * sublane)
    tm = min(tm, _round_up(M, sublane))

    # gamma stays f32: only D*4 bytes of bandwidth, preserves f32 internal math.
    g2d = gamma.reshape(1, D).astype(jnp.float32)

    nj = pl.cdiv(D, tn)             # lane blocks (outer)
    ni = pl.cdiv(M, tm)             # row blocks (inner)

    # Size the VMEM request from the actual double-buffered footprint + slack,
    # not the full physical VMEM (64 MiB/TC on v7x).
    blk_bytes = tm * tn * itemsize
    footprint = 4 * blk_bytes + 4 * tn * 4          # 2x in + 2x out + 2x gamma strip
    vmem_limit = int(min(max(footprint + (8 << 20), 16 << 20), 48 << 20))

    out = pl.pallas_call(
        _layerscale_kernel,
        out_shape=jax.ShapeDtypeStruct((M, D), x.dtype),
        grid=(nj, ni),              # lane axis outer -> gamma strip resident over inner loop
        in_specs=[
            pl.BlockSpec((tm, tn), lambda j, i: (i, j)),   # x tile
            pl.BlockSpec((1, tn), lambda j, i: (0, j)),    # gamma strip (f32)
        ],
        out_specs=pl.BlockSpec((tm, tn), lambda j, i: (i, j)),
        compiler_params=pltpu.CompilerParams(
            dimension_semantics=("parallel", "parallel"),
            vmem_limit_bytes=vmem_limit,
        ),
    )(x2d, g2d)

    return out.reshape(orig_shape)


def _reference(x, gamma):
    return (x.astype(jnp.float32) * gamma.astype(jnp.float32)).astype(x.dtype)


# ---------------------------------------------------------------------------
if __name__ == "__main__":
    key = jax.random.PRNGKey(0)
    k1, k2, k3, k4 = jax.random.split(key, 4)

    ok = True

    # 1) Module-faithful case: (B, N, dim) tokens, gamma = init_values * ones(dim)
    B, N, dim = 2, 8, 256
    x = jax.random.normal(k1, (B, N, dim), jnp.float32)
    gamma = 1e-5 * jnp.ones((dim,), jnp.float32)
    y = layer_scale(x, gamma)
    jax.block_until_ready(y)
    ok &= bool(jnp.allclose(y, _reference(x, gamma), atol=1e-6, rtol=1e-6))
    ok &= (y.shape == x.shape and y.dtype == x.dtype)

    # 2) Non-trivial (trained) gamma values.
    gamma2 = jax.random.normal(k2, (dim,), jnp.float32) * 0.1
    y2 = layer_scale(x, gamma2)
    jax.block_until_ready(y2)
    ok &= bool(jnp.allclose(y2, _reference(x, gamma2), atol=1e-6, rtol=1e-6))

    # 3) Ragged shape (exercises uneven edge blocks) and bf16 activations
    #    (exercises sublane=16 rounding and f32 gamma path).
    x3 = jax.random.normal(k3, (2, 17, 32), jnp.bfloat16)
    gamma3 = jax.random.normal(k4, (32,), jnp.float32) * 0.1
    y3 = layer_scale(x3, gamma3)
    jax.block_until_ready(y3)
    ok &= bool(jnp.allclose(y3.astype(jnp.float32),
                            _reference(x3, gamma3).astype(jnp.float32),
                            atol=1e-2, rtol=1e-2))
    ok &= (y3.shape == x3.shape and y3.dtype == x3.dtype)

    assert ok, "LayerScale Pallas kernel mismatch vs reference"
    print("KERNEL_OK")
</pallas_src>

<mosaic_0001>
module attributes {stable_mosaic.version = 11 : i64} {
  func.func @_layerscale_kernel(%arg0: i32, %arg1: i32, %arg2: memref<16x256xf32, #tpu.memory_space<vmem>>, %arg3: memref<1x256xf32, #tpu.memory_space<vmem>>, %arg4: memref<16x256xf32, #tpu.memory_space<vmem>>) attributes {dimension_semantics = [#tpu.dimension_semantics<parallel>, #tpu.dimension_semantics<parallel>], iteration_bounds = array<i64: 1, 1>, scalar_prefetch = 0 : i64, scratch_operands = 0 : i64, tpu.core_type = #tpu.core_type<tc>, window_params = [{transform_indices = @transform_0, window_bounds = array<i64: 16, 256>}, {transform_indices = @transform_1, window_bounds = array<i64: 1, 256>}, {transform_indices = @transform_2, window_bounds = array<i64: 16, 256>}]} {
    %c0 = arith.constant 0 : index
    %c0_0 = arith.constant 0 : index
    %0 = vector.load %arg2[%c0, %c0_0] : memref<16x256xf32, #tpu.memory_space<vmem>>, vector<16x256xf32>
    %c0_1 = arith.constant 0 : index
    %c0_2 = arith.constant 0 : index
    %1 = vector.load %arg3[%c0_1, %c0_2] : memref<1x256xf32, #tpu.memory_space<vmem>>, vector<1x256xf32>
    %2 = vector.broadcast %1 : vector<1x256xf32> to vector<16x256xf32>
    %3 = arith.mulf %0, %2 : vector<16x256xf32>
    %c0_3 = arith.constant 0 : index
    %c0_4 = arith.constant 0 : index
    %4 = vector.load %arg4[%c0_3, %c0_4] : memref<16x256xf32, #tpu.memory_space<vmem>>, vector<16x256xf32>
    tpu.vector_store %arg4[%c0_3, %c0_4], %3 {strides = array<i32>} : memref<16x256xf32, #tpu.memory_space<vmem>>, vector<16x256xf32>,
    return
  }
  func.func @transform_0(%arg0: i32, %arg1: i32) -> (i32, i32) {
    %c0_i32 = arith.constant 0 : i32
    return %arg1, %arg0 : i32, i32
  }
  func.func @transform_1(%arg0: i32, %arg1: i32) -> (i32, i32) {
    %c0_i32 = arith.constant 0 : i32
    %c0_i32_0 = arith.constant 0 : i32
    return %c0_i32, %arg0 : i32, i32
  }
  func.func @transform_2(%arg0: i32, %arg1: i32) -> (i32, i32) {
    %c0_i32 = arith.constant 0 : i32
    return %arg1, %arg0 : i32, i32
  }
}

</mosaic_0001>

<bundles_post_ra>
// kernel: tpu_custom_call.1
= control target key start
LH: loop header
LB: loop body
LE: loop exit
PB: predicated region body
PF: predicated region fallthrough
CT: control target
= control target key end

     0   :  { %7 = vsyncpa [#allocation3], 0  ;;  %s171_s0 = inlined_call_operand.hbm [shape: f32[16,256], index: 0, kind: input, shape index: {}]   ;;  %s172_s1 = inlined_call_operand.vmem [shape: f32[1,256], index: 1, kind: input, shape index: {}]   ;;  %s173_s2 = inlined_call_operand.hbm [shape: f32[16,256], index: 2, kind: output, shape index: {}]  }
   0x1   :  { %8 = vsyncpa [#allocation4], 0  ;;  %s119_s9 = smov [#allocation2]   ;;  %s71_s13 = scalar_lea.hbm %s171_s0, 512 }
   0x2   :  { %s14_s10 = sshll.u32 %s119_s9, 4  ;;  %p72_p0 = scmp.ne.s32.totalorder %s171_s0, %s71_s13  ;;  %s15_s10 = int_to_ptr.vmem [resolvable:$true] %s14_s10 }
   0x3   :  { %p75_p1 = scmp.lt.u32.totalorder %s71_s13, %s171_s0 }
   0x5   :  { %p77_p2 = pnand %p75_p1, %p72_p0 }
   0x7   :  { %80 = shalt.err (!%p77_p2)
}
   0x8   :  { %s81_s18 = scalar_lea.vmem %s15_s10, 512  ;;  %p86_p4 = scmp.lt.s32.totalorder %s15_s10, %s15_s10 }
   0x9   :  { %p82_p3 = scmp.ne.s32.totalorder %s15_s10, %s81_s18  ;;  %p87_p5 = scmp.lt.s32.totalorder %s81_s18, %s81_s18 }
   0xb   :  { %p88_p6 = por %p87_p5, %p86_p4 }
   0xd   :  { %p89_p7 = pnand %p88_p6, %p82_p3 }
   0xf   :  { %92 = shalt.err (!%p89_p7)
}
  0x10   :  { %s120_s19 = smov 256   ;;  %s121_s20 = smov 16  }
  0x11   :  { %20 = dma.hbm_to_vmem [thread:$0]  %s171_s0, 512, %s15_s10, [#allocation3], %s120_s19, %s120_s19, %s121_s20  }
  0x12   :  { %115 = dma.done.wait [#allocation3], 512  }
  0x13   :  { %116 = vsyncadd [#allocation3], 4294966784  ;;  %v32_v0 = vlaneseq  ;;  %v26_v4 = vld [vmem:[#allocation2] sm:$0xff]  ;;  %v27_v6 = vld [vmem:[#allocation2 + $0x8] sm:$0xff]  ;;  %s122_s25 = smov [#allocation5]  }
  0x14   :  { %v30_v5 = vld [vmem:[%s172_s1] sm:$0x3]  ;;  %s55_s26 = sshll.u32 %s122_s25, 4  ;;  %v28_v9 = vld [vmem:[#allocation2 + $0x10] sm:$0xff]  ;;  %v29_v10 = vld [vmem:[#allocation2 + $0x18] sm:$0xff]  ;;  %s56_s26 = int_to_ptr.vmem [resolvable:$true] %s55_s26 }
  0x15   :  { %v33_v1 = vshrl.u32 %v32_v0, 7  ;;  %s93_s0 = scalar_lea.vmem %s56_s26, 512  ;;  %p98_p9 = scmp.lt.s32.totalorder %s56_s26, %s56_s26 }
  0x16   :  { %p94_p8 = scmp.ne.s32.totalorder %s56_s26, %s93_s0  ;;  %p99_p10 = scmp.lt.s32.totalorder %s93_s0, %s93_s0 }
  0x17   :  { %v34_v2 = vsub.s32 0, %v33_v1  ;;  %v38_v3 = vsub.s32 1, %v33_v1 }
  0x18   :  { %p100_p11 = por %p99_p10, %p98_p9 }
  0x19   :  { %v35_v7 = vrot.slane %v30_v5, %v34_v2  ;;  %v39_v8 = vrot.slane %v30_v5, %v38_v3 }
  0x1a   :  { %p101_p12 = pnand %p100_p11, %p94_p8 }
  0x1b   :  { %v42_v11 = vmul.f32 %v35_v7, %v26_v4  ;;  %v43_v12 = vmul.f32 %v39_v8, %v27_v6  ;;  %v44_v13 = vmul.f32 %v35_v7, %v28_v9  ;;  %v45_v14 = vmul.f32 %v39_v8, %v29_v10 }
  0x1d   :  { %46 = vst [vmem:[#allocation5] sm:$0xff] %v42_v11  ;;  %47 = vst [vmem:[#allocation5 + $0x8] sm:$0xff] %v43_v12 }
  0x1e   :  { %48 = vst [vmem:[#allocation5 + $0x10] sm:$0xff] %v44_v13  ;;  %49 = vst [vmem:[#allocation5 + $0x18] sm:$0xff] %v45_v14 }
  0x1f   :  { %104 = shalt.err (!%p101_p12)
}
  0x20   :  { %s105_s28 = scalar_lea.hbm %s173_s2, 512 }
  0x21   :  { %p106_p13 = scmp.ne.s32.totalorder %s173_s2, %s105_s28  ;;  %p109_p0 = scmp.lt.u32.totalorder %s105_s28, %s173_s2 }
  0x23   :  { %p111_p1 = pnand %p109_p0, %p106_p13 }
  0x25   :  { %114 = shalt.err (!%p111_p1)
}
  0x26   :  { %61 = dma.vmem_to_hbm [thread:$0]  %s56_s26, 512, %s173_s2, [#allocation4], %s120_s19, %s120_s19, %s121_s20  }
  0x27   :  { %117 = dma.done.wait [#allocation4], 512  }
  0x28   :  { %118 = vsyncadd [#allocation4], 4294966784 }
  0x29   :  { %65 = vsyncpa [#allocation3], 1 }
  0x2a   :  { %66 = vsyncpa [#allocation4], 1 }

</bundles_post_ra>
